<compile_context>
chip_gen: v6e
topology: v6e:2x2x1
jax: 0.10.0
libtpu: 0.0.40
codegen_flags: <defaults>
</compile_context>

<pallas_src>
import functools

import jax
import jax.numpy as jnp
from jax.experimental import pallas as pl
from jax.experimental.pallas import tpu as pltpu


# Fuse the output transpose into the kernel only when store-lane utilization
# (no / 128) stays reasonable.  Review: worth it at no = 85, never at no = 8.
_FUSE_TRANSPOSE_MIN_NO = 64


def _vmem_config():
    """(block_budget_bytes, vmem_limit_bytes) adapted to the chip's VMEM size."""
    budget, limit = 4 << 20, 48 * 1024 * 1024          # safe for v7x (64 MiB VMEM)
    try:
        info = pltpu.get_tpu_info()
        cap = getattr(info, "vmem_capacity_bytes", None)
        if cap is not None and cap >= 100 * (1 << 20):  # v5e / v6e: 128 MiB VMEM
            budget, limit = 6 << 20, 64 * 1024 * 1024
    except Exception:
        pass
    return budget, limit


def _choose_tiles(BA: int, no: int, S: int, bytes_per_elem: int = 4,
                  block_budget_bytes: int = 4 << 20, min_blocks: int = 2):
    """Pick (TB, TS).  S must already be a multiple of 128 (wrapper pads).

    Keeps one block under the budget, prefers full-S lanes (one contiguous DMA
    per block) and guarantees >= min_blocks grid blocks whenever possible so
    v7x's two TensorCores both get work.
    """
    row_bytes = no * bytes_per_elem
    max_ts = max(128, (block_budget_bytes // row_bytes) // 128 * 128)

    if S <= max_ts:
        TS = S
    else:
        TS = 128
        t = min(max_ts, S) // 128 * 128
        while t >= 128:
            if S % t == 0:
                TS = t
                break
            t -= 128

    max_tb = max(1, block_budget_bytes // (row_bytes * TS))
    TB = 1
    for cand in range(min(BA, max_tb), 0, -1):
        if BA % cand == 0:
            TB = cand
            break

    # Megacore (v7x): make sure there are at least `min_blocks` grid blocks.
    def nblocks(tb, ts):
        return (BA // tb) * (S // ts)

    if nblocks(TB, TS) < min_blocks:
        for cand in range(TB, 0, -1):                   # shrink TB first: keeps
            if BA % cand == 0 and (BA // cand) >= min_blocks:  # lane-contiguous DMAs
                TB = cand
                break
        if nblocks(TB, TS) < min_blocks and TS > 128:
            t = (TS // 2) // 128 * 128
            while t >= 128:
                if S % t == 0 and nblocks(TB, t) >= min_blocks:
                    TS = t
                    break
                t -= 128
    return TB, TS


def _make_yolo_kernel(stride: float, new_coords: bool, fuse_transpose: bool, no: int):
    def decode(x, g, anc):
        # x: (..., no, TS); g: (..., 2, TS); anc: (..., 2, 1)
        if new_coords:
            xy = (x[..., 0:2, :] + g) * stride
            wh = (x[..., 2:4, :] * x[..., 2:4, :]) * anc     # anc pre-scaled x4
            rest = x[..., 4:, :]
        else:
            # sigmoid only where needed (rows 0:2, 4:no); exp only on rows 2:4.
            xy = (jax.nn.sigmoid(x[..., 0:2, :]) + g) * stride
            wh = jnp.exp(x[..., 2:4, :]) * anc
            rest = jax.nn.sigmoid(x[..., 4:, :])
        # Build the full tile, then ONE unmasked full-tile store (no vst.msk).
        return jnp.concatenate([xy, wh, rest], axis=-2)

    if fuse_transpose:
        def kernel(x_ref, grid_ref, anc_ref, o_ref):
            # x_ref: (1, no, TS); o_ref: (1, TS, no)
            y = decode(x_ref[0], grid_ref[0], anc_ref[0])          # (no, TS)
            pad = (-no) % 8                                        # sublane-align
            if pad:
                y = jnp.concatenate(
                    [y, jnp.zeros((pad, y.shape[-1]), y.dtype)], axis=0)
            yt = jnp.transpose(y, (1, 0))                          # XLU transpose
            o_ref[0] = yt[:, :no].astype(o_ref.dtype)
    else:
        def kernel(x_ref, grid_ref, anc_ref, o_ref):
            # x_ref / o_ref: (TB, no, TS)
            y = decode(x_ref[...], grid_ref[...], anc_ref[...])
            o_ref[...] = y.astype(o_ref.dtype)

    return kernel


@functools.partial(jax.jit,
                   static_argnames=("img_size", "num_classes", "new_coords", "in_place"))
def yolo_layer_forward(x, anchors, img_size: int, num_classes: int,
                       new_coords: bool, in_place: bool = False):
    """x: (bs, A*no, ny, nx) float32 (NCHW, like PyTorch). anchors: (A, 2)."""
    bs, C, ny, nx = x.shape
    no = num_classes + 5
    A = C // no
    assert C == A * no
    stride = img_size // ny
    S = ny * nx
    BA = bs * A
    Sp = ((S + 127) // 128) * 128          # pad spatial to a lane multiple

    # ---- layout glue: split channels into (anchor, pred), flatten spatial ----
    x_k = x.reshape(BA, no, S).astype(jnp.float32)
    if Sp != S:
        x_k = jnp.pad(x_k, ((0, 0), (0, 0), (0, Sp - S)))

    # ---- hoisted constants (computed once, resident in VMEM) ----
    gy, gx = jnp.meshgrid(jnp.arange(ny, dtype=jnp.float32),
                          jnp.arange(nx, dtype=jnp.float32), indexing="ij")
    grid_xy = jnp.stack([gx, gy], axis=0).reshape(1, 2, S)
    if Sp != S:
        grid_xy = jnp.pad(grid_xy, ((0, 0), (0, 0), (0, Sp - S)))

    anchors_f = anchors.astype(jnp.float32)
    if new_coords:
        anchors_f = anchors_f * 4.0        # fold the x4 into the anchor table
    anc_k = jnp.tile(anchors_f, (bs, 1)).reshape(BA, 2, 1)

    # ---- tiling ----
    budget, vmem_limit = _vmem_config()
    fuse_transpose = no >= _FUSE_TRANSPOSE_MIN_NO
    TB, TS = _choose_tiles(BA, no, Sp, block_budget_bytes=budget)
    if fuse_transpose:
        TB = 1                             # fused path: one clean 2-D transpose/block
    grid = (BA // TB, Sp // TS)

    kernel = _make_yolo_kernel(float(stride), new_coords, fuse_transpose, no)

    in_specs = [
        pl.BlockSpec((TB, no, TS), lambda i, j: (i, 0, j)),   # x
        pl.BlockSpec((1, 2, TS), lambda i, j: (0, 0, j)),     # spatial grid
        pl.BlockSpec((TB, 2, 1), lambda i, j: (i, 0, 0)),     # anchor scales
    ]
    compiler_params = pltpu.CompilerParams(
        dimension_semantics=("parallel", "parallel"),
        vmem_limit_bytes=vmem_limit,
    )

    if fuse_transpose:
        # Kernel writes (TS, no) blocks: the module's (bs, A*ny*nx, no) output
        # is then a free contiguous reshape — no second HBM pass.
        out_k = pl.pallas_call(
            kernel,
            out_shape=jax.ShapeDtypeStruct((BA, Sp, no), jnp.float32),
            grid_spec=pltpu.PrefetchScalarGridSpec(
                num_scalar_prefetch=0, grid=grid,
                in_specs=in_specs,
                out_specs=pl.BlockSpec((1, TS, no), lambda i, j: (i, j, 0)),
            ),
            compiler_params=compiler_params,
        )(x_k, grid_xy, anc_k)
        if Sp != S:
            out_k = out_k[:, :S, :]
        out = out_k.reshape(bs, A * S, no)
    else:
        # Small `no` (e.g. 8): fusing the transpose would drop store-lane
        # utilization to no/128, so the relayout stays in XLA (review guidance).
        alias = {0: 0} if in_place else {}
        out_k = pl.pallas_call(
            kernel,
            out_shape=jax.ShapeDtypeStruct((BA, no, Sp), jnp.float32),
            grid_spec=pltpu.PrefetchScalarGridSpec(
                num_scalar_prefetch=0, grid=grid,
                in_specs=in_specs,
                out_specs=pl.BlockSpec((TB, no, TS), lambda i, j: (i, 0, j)),
            ),
            compiler_params=compiler_params,
            input_output_aliases=alias,
        )(x_k, grid_xy, anc_k)
        if Sp != S:
            out_k = out_k[:, :, :S]
        out = (out_k.reshape(bs, A, no, ny, nx)
                    .transpose(0, 1, 3, 4, 2)
                    .reshape(bs, A * S, no))
    return out


def _reference(x, anchors, img_size, num_classes, new_coords):
    """Pure-JAX reference mirroring the PyTorch forward (eval mode)."""
    bs, C, ny, nx = x.shape
    no = num_classes + 5
    A = C // no
    stride = img_size // ny
    anchors_f = anchors.astype(jnp.float32)
    anchor_grid = anchors_f.reshape(1, A, 1, 1, 2)
    xp = x.reshape(bs, A, no, ny, nx).transpose(0, 1, 3, 4, 2)
    yv, xv = jnp.meshgrid(jnp.arange(ny), jnp.arange(nx), indexing="ij")
    grid = jnp.stack((xv, yv), 2).reshape(1, 1, ny, nx, 2).astype(jnp.float32)
    if new_coords:
        xy = (xp[..., 0:2] + grid) * stride
        wh = xp[..., 2:4] ** 2 * (4 * anchor_grid)
        rest = xp[..., 4:]
    else:
        xy = (jax.nn.sigmoid(xp[..., 0:2]) + grid) * stride
        wh = jnp.exp(xp[..., 2:4]) * anchor_grid
        rest = jax.nn.sigmoid(xp[..., 4:])
    out = jnp.concatenate([xy, wh, rest], axis=-1)
    return out.reshape(bs, -1, no)


if __name__ == "__main__":
    anchors_list = [(10, 13), (16, 30), (33, 23)]
    anchors = jnp.array(anchors_list, dtype=jnp.float32)
    A = len(anchors_list)
    key = jax.random.PRNGKey(0)

    def run_case(key, bs, ny, nx, img_size, num_classes, new_coords, in_place=False):
        no = num_classes + 5
        x = jax.random.normal(key, (bs, A * no, ny, nx), dtype=jnp.float32)
        out = jax.block_until_ready(
            yolo_layer_forward(x, anchors, img_size, num_classes, new_coords,
                               in_place=in_place))
        ref = _reference(x, anchors, img_size, num_classes, new_coords)
        assert out.shape == (bs, A * ny * nx, no), out.shape
        assert jnp.allclose(out, ref, atol=1e-5, rtol=1e-5)

    keys = jax.random.split(key, 5)
    # 1) small head (no=8), relayout path, standard decode
    run_case(keys[0], bs=2, ny=16, nx=16, img_size=64, num_classes=3, new_coords=False)
    # 2) small head, YOLOv7 new_coords branch, in-place aliasing exercised
    run_case(keys[1], bs=2, ny=16, nx=16, img_size=64, num_classes=3, new_coords=True,
             in_place=True)
    # 3) realistic head (no=85): fused in-kernel transpose path
    run_case(keys[2], bs=1, ny=16, nx=16, img_size=64, num_classes=80, new_coords=False)
    # 4) fused path, new_coords branch
    run_case(keys[3], bs=1, ny=16, nx=16, img_size=64, num_classes=80, new_coords=True)
    # 5) non-128-divisible spatial (S=144 -> padded to 256)
    run_case(keys[4], bs=2, ny=12, nx=12, img_size=48, num_classes=3, new_coords=False)

    print("KERNEL_OK")
</pallas_src>

<mosaic_0001>
module attributes {stable_mosaic.version = 11 : i64} {
  func.func @kernel(%arg0: i32, %arg1: i32, %arg2: memref<3x8x256xf32, #tpu.memory_space<vmem>>, %arg3: memref<1x2x256xf32, #tpu.memory_space<vmem>>, %arg4: memref<3x2x1xf32, #tpu.memory_space<vmem>>, %arg5: memref<3x8x256xf32, #tpu.memory_space<vmem>>) attributes {dimension_semantics = [#tpu.dimension_semantics<parallel>, #tpu.dimension_semantics<parallel>], iteration_bounds = array<i64: 2, 1>, scalar_prefetch = 0 : i64, scratch_operands = 0 : i64, tpu.core_type = #tpu.core_type<tc>, window_params = [{transform_indices = @transform_0, window_bounds = array<i64: 3, 8, 256>}, {transform_indices = @transform_1, window_bounds = array<i64: 1, 2, 256>}, {transform_indices = @transform_2, window_bounds = array<i64: 3, 2, 1>}, {transform_indices = @transform_3, window_bounds = array<i64: 3, 8, 256>}]} {
    %c0 = arith.constant 0 : index
    %c0_0 = arith.constant 0 : index
    %c0_1 = arith.constant 0 : index
    %0 = vector.load %arg2[%c0, %c0_0, %c0_1] : memref<3x8x256xf32, #tpu.memory_space<vmem>>, vector<3x8x256xf32>
    %c0_2 = arith.constant 0 : index
    %c0_3 = arith.constant 0 : index
    %c0_4 = arith.constant 0 : index
    %1 = vector.load %arg3[%c0_2, %c0_3, %c0_4] : memref<1x2x256xf32, #tpu.memory_space<vmem>>, vector<1x2x256xf32>
    %c0_5 = arith.constant 0 : index
    %c0_6 = arith.constant 0 : index
    %c0_7 = arith.constant 0 : index
    %2 = vector.load %arg4[%c0_5, %c0_6, %c0_7] : memref<3x2x1xf32, #tpu.memory_space<vmem>>, vector<3x2x1xf32>
    %3 = vector.extract_strided_slice %0 {offsets = [0, 0, 0], sizes = [3, 2, 256], strides = [1, 1, 1]} : vector<3x8x256xf32> to vector<3x2x256xf32>
    %4 = arith.negf %3 : vector<3x2x256xf32>
    %5 = math.exp %4 : vector<3x2x256xf32>
    %cst = arith.constant 1.000000e+00 : f32
    %6 = vector.broadcast %cst : f32 to vector<3x2x256xf32>
    %7 = arith.addf %6, %5 : vector<3x2x256xf32>
    %8 = arith.divf %6, %7 : vector<3x2x256xf32>
    %9 = vector.broadcast %1 : vector<1x2x256xf32> to vector<3x2x256xf32>
    %10 = arith.addf %8, %9 : vector<3x2x256xf32>
    %cst_8 = arith.constant 4.000000e+00 : f32
    %11 = vector.broadcast %cst_8 : f32 to vector<3x2x256xf32>
    %12 = arith.mulf %10, %11 : vector<3x2x256xf32>
    %13 = vector.extract_strided_slice %0 {offsets = [0, 2, 0], sizes = [3, 2, 256], strides = [1, 1, 1]} : vector<3x8x256xf32> to vector<3x2x256xf32>
    %14 = math.exp %13 : vector<3x2x256xf32>
    %15 = vector.broadcast %2 : vector<3x2x1xf32> to vector<3x2x256xf32>
    %16 = arith.mulf %14, %15 : vector<3x2x256xf32>
    %17 = vector.extract_strided_slice %0 {offsets = [0, 4, 0], sizes = [3, 4, 256], strides = [1, 1, 1]} : vector<3x8x256xf32> to vector<3x4x256xf32>
    %18 = arith.negf %17 : vector<3x4x256xf32>
    %19 = math.exp %18 : vector<3x4x256xf32>
    %cst_9 = arith.constant 1.000000e+00 : f32
    %20 = vector.broadcast %cst_9 : f32 to vector<3x4x256xf32>
    %21 = arith.addf %20, %19 : vector<3x4x256xf32>
    %22 = arith.divf %20, %21 : vector<3x4x256xf32>
    %23 = tpu.concatenate %12, %16, %22 in 1 : vector<3x2x256xf32>, vector<3x2x256xf32>, vector<3x4x256xf32> -> vector<3x8x256xf32>
    %c0_10 = arith.constant 0 : index
    %c0_11 = arith.constant 0 : index
    %c0_12 = arith.constant 0 : index
    %24 = vector.load %arg5[%c0_10, %c0_11, %c0_12] : memref<3x8x256xf32, #tpu.memory_space<vmem>>, vector<3x8x256xf32>
    tpu.vector_store %arg5[%c0_10, %c0_11, %c0_12], %23 {strides = array<i32>} : memref<3x8x256xf32, #tpu.memory_space<vmem>>, vector<3x8x256xf32>,
    return
  }
  func.func @transform_0(%arg0: i32, %arg1: i32) -> (i32, i32, i32) {
    %c0_i32 = arith.constant 0 : i32
    %c0_i32_0 = arith.constant 0 : i32
    return %arg0, %c0_i32, %arg1 : i32, i32, i32
  }
  func.func @transform_1(%arg0: i32, %arg1: i32) -> (i32, i32, i32) {
    %c0_i32 = arith.constant 0 : i32
    %c0_i32_0 = arith.constant 0 : i32
    %c0_i32_1 = arith.constant 0 : i32
    return %c0_i32, %c0_i32_0, %arg1 : i32, i32, i32
  }
  func.func @transform_2(%arg0: i32, %arg1: i32) -> (i32, i32, i32) {
    %c0_i32 = arith.constant 0 : i32
    %c0_i32_0 = arith.constant 0 : i32
    %c0_i32_1 = arith.constant 0 : i32
    return %arg0, %c0_i32, %c0_i32_0 : i32, i32, i32
  }
  func.func @transform_3(%arg0: i32, %arg1: i32) -> (i32, i32, i32) {
    %c0_i32 = arith.constant 0 : i32
    %c0_i32_0 = arith.constant 0 : i32
    return %arg0, %c0_i32, %arg1 : i32, i32, i32
  }
}

</mosaic_0001>

<bundles_post_ra>
// kernel: yolo_layer_forward.1
= control target key start
LH: loop header
LB: loop body
LE: loop exit
PB: predicated region body
PF: predicated region fallthrough
CT: control target
= control target key end

     0   :  { %s634_s12 = smov 0   ;;  %s636_s13 = smov 0   ;;  %s693_s0 = inlined_call_operand.vmem [shape: f32[6,8,256], index: 0, kind: input, shape index: {}]   ;;  %s694_s1 = inlined_call_operand.vmem [shape: f32[1,2,256], index: 1, kind: input, shape index: {}]   ;;  %s695_s2 = inlined_call_operand.vmem [shape: f32[6,2,1], index: 2, kind: input, shape index: {}]   ;;  %s696_s3 = inlined_call_operand.vmem [shape: f32[6,8,256], index: 3, kind: output, shape index: {}]  }
   0x1   :  { %s638_s14 = smov 0  }
   0x2 LB: > { %s25_s15 = sadd.s32 1, %s607_s13  ;;  %p509_p0 = scmp.ge.s32.totalorder %s611_s14, 1  ;;  %s611_s14 = sphi %s638_s14, %s13_s14   ;;  %s607_s13 = sphi %s636_s13, %s698_s13   ;;  %s603_s12 = sphi %s634_s12, %s697_s12  }
   0x3   : > { %p27_p1 = scmp.ge.s32.totalorder %s25_s15, 2  ;;  %p182_p2 = scmp.lt.s32.totalorder %s611_s14, 3 }
   0x5   : > { %s700_s15 = smov (%p27_p1, %s25_s15), 0  ;;  %p183_p3 = pnand %p509_p0, %p182_p2 }
   0x6   : > { %s226_s16 = smul.u32 (!%p183_p3), 3, %s603_s12 }
   0x7   : > { %186 = sbr.rel (%p183_p3) target bundleno = 151 (0x97), region = 32 }
   0x8   : > { %p228_p4 = scmp.lt.s32.totalorder (!%p183_p3), %s226_s16, 5 }
   0xc   : > { %v613_v0 = vmov 0   ;;  %s702_s16 = smov (!%p228_p4, %s226_s16), 5  ;;  %v521_v34 = vld.sshfl [vmem:[%s694_s1] sm:$0x33 pattern:$0x76325410] }
   0xd   : > { %551 = vset.pattern.permute.xlu0 %v613_v0  ;;  %552 = vset.pattern.permute.xlu1 %v613_v0  ;;  %s512_s17 = sshll.u32 %s702_s16, 1  ;;  %s524_s21 = sshll.u32 %s702_s16, 4  ;;  %v316_v37 = vcombine.high %v521_v34, %v521_v34  ;;  %vm367_vm0 = vcmask 1041408   ;;  %vm374_vm1 = vcmask 1043456  }
   0xe   : > { %s248_s20 = scalar_lea.vmem %s695_s2, %s512_s17  ;;  %s235_s24 = scalar_lea.vmem %s693_s0, %s524_s21 }
   0xf   : > { %v269_v1 = vld [vmem:[%s248_s20] sm:$0x3]  ;;  %v270_v2 = vld [vmem:[%s248_s20 + $0x2] sm:$0x3]  ;;  %v271_v3 = vld [vmem:[%s248_s20 + $0x4] sm:$0x3]  ;;  %s259_s29 = scalar_lea.vmem %s696_s3, %s524_s21 }
  0x10   : > { %345 = vperm.xlu0 %551, %v269_v1   ;;  %353 = vperm.xlu1 %552, %v271_v3   ;;  %v262_v4 = vld [vmem:[%s235_s24] sm:$0xff]  ;;  %v263_v5 = vld [vmem:[%s235_s24 + $0x8] sm:$0xff]  ;;  %v264_v6 = vld [vmem:[%s235_s24 + $0x10] sm:$0xff] }
  0x11   : > { %v265_v7 = vld [vmem:[%s235_s24 + $0x18] sm:$0xff]  ;;  %v515_v8 = vmul.f32 -1.442695, %v262_v4  ;;  %v266_v9 = vld [vmem:[%s235_s24 + $0x20] sm:$0xff]  ;;  %v516_v10 = vmul.f32 -1.442695, %v263_v5 }
  0x12   : > { %v267_v11 = vld [vmem:[%s235_s24 + $0x28] sm:$0xff]  ;;  %v517_v12 = vmul.f32 -1.442695, %v264_v6  ;;  %v518_v13 = vmul.f32 -1.442695, %v265_v7 }
  0x13   : > { %553 = vpow2.f32 %v515_v8  ;;  %v519_v14 = vmul.f32 -1.442695, %v266_v9  ;;  %v520_v15 = vmul.f32 -1.442695, %v267_v11  ;;  %v331_v28 = vmul.f32 1.442695, %v262_v4 }
  0x14   : > { %349 = vperm.xlu0 %551, %v270_v2   ;;  %555 = vpow2.f32 %v516_v10  ;;  %v333_v29 = vmul.f32 1.442695, %v263_v5  ;;  %v335_v30 = vmul.f32 1.442695, %v264_v6  ;;  %v337_v31 = vmul.f32 1.442695, %v265_v7 }
  0x15   : > { %557 = vpow2.f32 %v517_v12  ;;  %v339_v32 = vmul.f32 1.442695, %v266_v9  ;;  %v341_v33 = vmul.f32 1.442695, %v267_v11 }
  0x16   : > { %559 = vpow2.f32 %v518_v13 }
  0x17   : > { %561 = vpow2.f32 %v519_v14 }
  0x18   : > { %563 = vpow2.f32 %v520_v15 }
  0x20   : > { %v554_v16 = vpop.eup %553 }
  0x21   : > { %v556_v17 = vpop.eup %555  ;;  %v290_v20 = vadd.f32 1.0, %v554_v16 }
  0x22   : > { %v558_v18 = vpop.eup %557  ;;  %v291_v22 = vadd.f32 1.0, %v556_v17 }
  0x23   : > { %v560_v19 = vpop.eup %559  ;;  %v292_v24 = vadd.f32 1.0, %v558_v18  ;;  %565 = vrcp.f32 %v290_v20 }
  0x24   : > { %v562_v21 = vpop.eup %561  ;;  %v293_v25 = vadd.f32 1.0, %v560_v19  ;;  %567 = vrcp.f32 %v291_v22 }
  0x25   : > { %v564_v23 = vpop.eup %563  ;;  %v294_v26 = vadd.f32 1.0, %v562_v21  ;;  %569 = vrcp.f32 %v292_v24 }
  0x26   : > { %v295_v27 = vadd.f32 1.0, %v564_v23  ;;  %571 = vrcp.f32 %v293_v25 }
  0x27   : > { %573 = vrcp.f32 %v294_v26 }
  0x28   : > { %575 = vrcp.f32 %v295_v27 }
  0x29   : > { %577 = vpow2.f32 %v331_v28 }
  0x2a   : > { %579 = vpow2.f32 %v333_v29 }
  0x2b   : > { %581 = vpow2.f32 %v335_v30 }
  0x2c   : > { %583 = vpow2.f32 %v337_v31 }
  0x2d   : > { %585 = vpow2.f32 %v339_v32 }
  0x2e   : > { %587 = vpow2.f32 %v341_v33 }
  0x30   : > { %v566_v35 = vpop.eup %565 }
  0x31   : > { %v568_v36 = vpop.eup %567  ;;  %v319_v42 = vadd.f32 %v566_v35, %v521_v34 }
  0x32   : > { %v570_v38 = vpop.eup %569  ;;  %v320_v43 = vadd.f32 %v568_v36, %v316_v37 }
  0x33   : > { %v572_v39 = vpop.eup %571  ;;  %v321_v47 = vadd.f32 %v570_v38, %v521_v34  ;;  %v325_v52 = vmul.f32 4.0, %v319_v42 }
  0x34   : > { %v574_v40 = vpop.eup %573  ;;  %v322_v48 = vadd.f32 %v572_v39, %v316_v37  ;;  %v326_v53 = vmul.f32 4.0, %v320_v43 }
  0x35   : > { %v576_v41 = vpop.eup %575  ;;  %v323_v49 = vadd.f32 %v574_v40, %v521_v34  ;;  %v327_v61 = vmul.f32 4.0, %v321_v47 }
  0x36   : > { %v578_v44 = vpop.eup %577  ;;  %v324_v50 = vadd.f32 %v576_v41, %v316_v37  ;;  %v328_v62 = vmul.f32 4.0, %v322_v48 }
  0x37   : > { %v580_v45 = vpop.eup %579  ;;  %v329_v0 = vmul.f32 4.0, %v323_v49 }
  0x38   : > { %v582_v51 = vpop.eup %581  ;;  %v330_v1 = vmul.f32 4.0, %v324_v50 }
  0x39   : > { %v584_v55 = vpop.eup %583 }
  0x3a   : > { %v586_v56 = vpop.eup %585 }
  0x3b   : > { %v588_v59 = vpop.eup %587 }
  0x8b   : > { %v346_v46 = vpop.permute.xlu0 %345  ;;  %v354_v63 = vpop.permute.xlu1 %353 }
  0x8c   : > { %v355_v54 = vrot.slane %v346_v46, 6  ;;  %v357_v5 = vrot.slane %v354_v63, 6 }
  0x8e   : > { %v361_v57 = vmul.f32 %v578_v44, %v355_v54  ;;  %v362_v58 = vmul.f32 %v580_v45, %v355_v54  ;;  %v365_v10 = vmul.f32 %v586_v56, %v357_v5  ;;  %v366_v11 = vmul.f32 %v588_v59, %v357_v5 }
  0x8f   : > { %v350_v60 = vpop.permute.xlu0 %349 }
  0x90   : > { %v368_v2 = vsel %vm367_vm0, %v325_v52, %v361_v57  ;;  %v369_v3 = vsel %vm367_vm0, %v326_v53, %v362_v58  ;;  %v356_v4 = vrot.slane %v350_v60, 6  ;;  %v372_v14 = vsel %vm367_vm0, %v329_v0, %v365_v10 }
  0x91   : > { %v375_v6 = vsel %vm374_vm1, %v368_v2, %v566_v35  ;;  %v376_v7 = vsel %vm374_vm1, %v369_v3, %v568_v36  ;;  %v373_v15 = vsel %vm367_vm0, %v330_v1, %v366_v11  ;;  %v379_v18 = vsel %vm374_vm1, %v372_v14, %v574_v40 }
  0x92   : > { %381 = vst [vmem:[%s259_s29] sm:$0xff] %v375_v6  ;;  %382 = vst [vmem:[%s259_s29 + $0x8] sm:$0xff] %v376_v7  ;;  %v363_v8 = vmul.f32 %v582_v51, %v356_v4  ;;  %v364_v9 = vmul.f32 %v584_v55, %v356_v4  ;;  %v380_v19 = vsel %vm374_vm1, %v373_v15, %v576_v41 }
  0x93   : > { %385 = vst [vmem:[%s259_s29 + $0x20] sm:$0xff] %v379_v18  ;;  %386 = vst [vmem:[%s259_s29 + $0x28] sm:$0xff] %v380_v19 }
  0x94   : > { %v370_v12 = vsel %vm367_vm0, %v327_v61, %v363_v8  ;;  %v371_v13 = vsel %vm367_vm0, %v328_v62, %v364_v9 }
  0x95   : > { %v377_v16 = vsel %vm374_vm1, %v370_v12, %v570_v38  ;;  %v378_v17 = vsel %vm374_vm1, %v371_v13, %v572_v39 }
  0x96   : > { %383 = vst [vmem:[%s259_s29 + $0x10] sm:$0xff] %v377_v16  ;;  %384 = vst [vmem:[%s259_s29 + $0x18] sm:$0xff] %v378_v17 }
  0x97 PF: > { %s13_s14 = sadd.s32 1, %s611_s14   ;;  %s697_s12 = smov %s607_s13 }
  0x98   : > { %p10_p5 = scmp.ge.s32.totalorder %s13_s14, 4   ;;  %s698_s13 = smov %s700_s15 }
  0x9a   :  { %12 = sbr.rel (!%p10_p5) target bundleno = 2 (0x2), region = 68 }

</bundles_post_ra>
